<compile_context>
chip_gen: v5e
topology: v5e:2x2
jax: 0.10.0
libtpu: 0.0.40
codegen_flags: <defaults>
</compile_context>

<pallas_src>
import functools
import math

import jax
import jax.numpy as jnp
from jax.experimental import pallas as pl
from jax.experimental.pallas import tpu as pltpu


_VMEM_LIMIT_BYTES = 56 * 1024 * 1024  # > 16/32 MiB defaults, < v7x 64 MiB phys


def _default_use_bf16():
    """bf16 MXU operands by default on v6e/v7x; f32 elsewhere."""
    try:
        kind = jax.devices()[0].device_kind.lower()
    except Exception:
        return False
    return ("v6" in kind) or ("v7" in kind)


def _pick_block_batch(B, N):
    """Pack batch elements per grid step so the MXU M-dim is well fed."""
    target_rows = 256          # v6e/v7x MXU rows (also fine for v5e's 128)
    max_rows = 4096            # keep projection operand blocks modest
    max_adj_bytes = 8 << 20    # int8 adjacency block budget (double-buffered)
    bt = 1
    for d in range(1, B + 1):
        if B % d:
            continue
        if d * N > max_rows or d * N * N > max_adj_bytes:
            break
        if d != B and (d * N) % 8:
            continue           # keep the 2-D x/output row blocks sublane-aligned
        bt = d
        if d * N >= target_rows:
            break
    return bt


def _gat_fused_kernel(x_ref, adj_ref, w1_ref, w2_ref, o_ref, h1_ref, *,
                      alpha, nheads, nhid, nclass, n_nodes, bt, col_tile,
                      use_bf16_mxu):
    """Whole GAT forward for `bt` batch elements.

    x_ref  : (bt*N, Fin)           node features (f32 or bf16)
    adj_ref: (bt, N, N)  int8      adjacency mask
    w1_ref : (Fin, H*nhid + 2H)    [W_0..W_{H-1} | W_h@a1_h | W_h@a2_h]
    w2_ref : (H*nhid, nclass + 2)  [Wo | Wo@ao1 | Wo@ao2]
    o_ref  : (bt, N, nclass)       output (f32)
    h1_ref : (bt*N, H*nhid)        VMEM scratch = layer-1 concat target
    """
    N = n_nodes
    hf = nheads * nhid
    neg_big = jnp.float32(-9.0e15)       # torch's -9e15 mask sentinel

    def mxu(a, b):
        if use_bf16_mxu:
            a = a.astype(jnp.bfloat16)
            b = b.astype(jnp.bfloat16)
        return jnp.dot(a, b, preferred_element_type=jnp.float32)

    def elu(v):
        # NOTE: exp(v)-1 instead of expm1 (Mosaic lowering support varies);
        # the precision difference near 0 is ~1e-7, negligible here.
        return jnp.where(v > 0, v, jnp.exp(v) - 1.0)

    def attention(bi, wh, wh1_col, wh2_row, fout):
        """softmax-over-rows attention, h' accumulated over column tiles.

        Each column tile holds *complete* softmax columns, so the reduction
        is exact within the tile and h' accumulation needs no rescaling.
        """
        hp = jnp.zeros((N, fout), jnp.float32)
        for j0 in range(0, N, col_tile):
            jw = min(col_tile, N - j0)
            adj_t = adj_ref[bi, :, j0:j0 + jw].astype(jnp.float32)   # (N, jw)
            e = wh1_col + wh2_row[:, j0:j0 + jw]                     # (N, jw)
            e = jnp.where(e > 0, e, alpha * e)                       # LeakyReLU
            e = jnp.where(adj_t > 0, e, neg_big)                     # mask
            # softmax over the row index (torch dim=1)
            m = jnp.max(e, axis=0, keepdims=True)                    # (1, jw)
            p = jnp.exp(e - m)
            s = jnp.sum(p, axis=0, keepdims=True)
            p = p * pl.reciprocal(s, approx=True)                    # EUP recip
            hp = hp + mxu(p, wh[j0:j0 + jw, :])                      # MXU
        return hp

    # ---- layer 1: one shared projection matmul for all heads & elements ----
    proj1 = mxu(x_ref[...], w1_ref[...])                 # (bt*N, hf + 2H)
    for bi in range(bt):
        p1 = proj1[bi * N:(bi + 1) * N, :]               # (N, hf + 2H)
        # one transpose for all heads' Wh@a2 columns (sublane rows per head)
        wh2_t = p1[:, hf + nheads:hf + 2 * nheads].T     # (H, N)
        for hd in range(nheads):
            wh = p1[:, hd * nhid:(hd + 1) * nhid]        # (N, nhid)
            wh1 = p1[:, hf + hd:hf + hd + 1]             # (N, 1)
            wh2r = wh2_t[hd:hd + 1, :]                   # (1, N)
            hp = elu(attention(bi, wh, wh1, wh2r, nhid))
            h1_ref[bi * N:(bi + 1) * N, hd * nhid:(hd + 1) * nhid] = hp

    # ---- layer 2: output GAT layer (concat=False) + final F.elu ----
    proj2 = mxu(h1_ref[...], w2_ref[...])                # (bt*N, nclass + 2)
    for bi in range(bt):
        p2 = proj2[bi * N:(bi + 1) * N, :]
        wh_o = p2[:, :nclass]                            # (N, nclass)
        wh1_o = p2[:, nclass:nclass + 1]                 # (N, 1)
        wh2_o = p2[:, nclass + 1:nclass + 2].T           # (1, N)
        out = attention(bi, wh_o, wh1_o, wh2_o, nclass)
        o_ref[bi] = elu(out)                             # final F.elu fused


def _build_fused_weights(params):
    """Fold per-head W and attention vectors into two fused weight matrices."""
    heads = params["heads"]
    H = len(heads)
    nhid = heads[0][0].shape[1]
    W_all = jnp.concatenate([W for (W, _) in heads], axis=1)             # (Fin, H*nhid)
    A1 = jnp.concatenate([W @ a[:nhid, :] for (W, a) in heads], axis=1)  # (Fin, H)
    A2 = jnp.concatenate([W @ a[nhid:, :] for (W, a) in heads], axis=1)  # (Fin, H)
    W_big1 = jnp.concatenate([W_all, A1, A2], axis=1)                    # (Fin, H*nhid+2H)

    Wo, ao = params["out"]
    nclass = Wo.shape[1]
    W_big2 = jnp.concatenate(
        [Wo, Wo @ ao[:nclass, :], Wo @ ao[nclass:, :]], axis=1)          # (H*nhid, nclass+2)
    return W_big1, W_big2, H, nhid, nclass


def gat_forward(x, adj, params, *, alpha, use_bf16_mxu=None, col_tile=None):
    """Full GAT forward (eval mode) as one fused pallas_call."""
    B, N, Fin = x.shape
    if use_bf16_mxu is None:
        use_bf16_mxu = _default_use_bf16()

    W1, W2, H, nhid, nclass = _build_fused_weights(params)
    K1, K2 = W1.shape[1], W2.shape[1]
    HF = H * nhid

    if col_tile is None:
        col_tile = min(N, 512)
    col_tile = max(1, min(int(col_tile), N))

    bt = _pick_block_batch(B, N)
    assert bt == B or (bt * N) % 8 == 0, (
        "batch packing needs sublane-aligned row blocks (bt*N % 8 == 0)")

    in_dtype = jnp.bfloat16 if use_bf16_mxu else jnp.float32
    x2d = x.reshape(B * N, Fin).astype(in_dtype)
    if use_bf16_mxu:
        W1 = W1.astype(jnp.bfloat16)
        W2 = W2.astype(jnp.bfloat16)
    adj_i8 = (adj > 0).astype(jnp.int8)                  # mask-only adjacency

    kernel = functools.partial(
        _gat_fused_kernel, alpha=alpha, nheads=H, nhid=nhid, nclass=nclass,
        n_nodes=N, bt=bt, col_tile=col_tile, use_bf16_mxu=use_bf16_mxu)

    return pl.pallas_call(
        kernel,
        out_shape=jax.ShapeDtypeStruct((B, N, nclass), jnp.float32),
        grid_spec=pltpu.PrefetchScalarGridSpec(
            num_scalar_prefetch=0,
            grid=(B // bt,),
            in_specs=[
                pl.BlockSpec((bt * N, Fin), lambda b: (b, 0)),
                pl.BlockSpec((bt, N, N), lambda b: (b, 0, 0)),
                pl.BlockSpec((Fin, K1), lambda b: (0, 0)),
                pl.BlockSpec((HF, K2), lambda b: (0, 0)),
            ],
            out_specs=pl.BlockSpec((bt, N, nclass), lambda b: (b, 0, 0)),
            scratch_shapes=[pltpu.VMEM((bt * N, HF), jnp.float32)],
        ),
        compiler_params=pltpu.CompilerParams(
            dimension_semantics=("parallel",),
            vmem_limit_bytes=_VMEM_LIMIT_BYTES),
    )(x2d, adj_i8, W1, W2)


# --------------------------- reference (pure JAX) ---------------------------

def gat_reference(x, adj, params, alpha):
    def layer(h, adj, W, a, concat):
        Fout = W.shape[1]
        Wh = jnp.einsum("bnf,fo->bno", h, W)
        wh1 = Wh @ a[:Fout, :]                     # (B, N, 1)
        wh2 = Wh @ a[Fout:, :]                     # (B, N, 1)
        e = wh1 + jnp.swapaxes(wh2, 1, 2)          # (B, N, N)
        e = jnp.where(e > 0, e, alpha * e)
        att = jnp.where(adj > 0, e, -9.0e15)
        att = jax.nn.softmax(att, axis=1)
        hp = jnp.einsum("bij,bjo->bio", att, Wh)
        return jax.nn.elu(hp) if concat else hp

    hs = [layer(x, adj, W, a, True) for (W, a) in params["heads"]]
    h = jnp.concatenate(hs, axis=2)
    Wo, ao = params["out"]
    return jax.nn.elu(layer(h, adj, Wo, ao, False))


# --------------------------- init helpers ---------------------------

def xavier_uniform(key, shape, gain):
    fan_in, fan_out = shape[0], shape[1]
    bound = gain * math.sqrt(6.0 / (fan_in + fan_out))
    return jax.random.uniform(key, shape, jnp.float32, -bound, bound)


def init_gat_params(key, nfeat, nhid, nclass, nheads):
    params = {"heads": [], "out": None}
    gain = 1.414
    for _ in range(nheads):
        key, kw, ka = jax.random.split(key, 3)
        W = xavier_uniform(kw, (nfeat, nhid), gain)
        a = xavier_uniform(ka, (2 * nhid, 1), gain)
        params["heads"].append((W, a))
    key, kw, ka = jax.random.split(key, 3)
    Wo = xavier_uniform(kw, (nhid * nheads, nclass), gain)
    ao = xavier_uniform(ka, (2 * nclass, 1), gain)
    params["out"] = (Wo, ao)
    return params


if __name__ == "__main__":
    B, N = 2, 16
    nfeat, nhid, nclass, nheads = 16, 8, 4, 2
    alpha = 0.2

    key = jax.random.PRNGKey(0)
    kx, kadj, kp = jax.random.split(key, 3)

    x = jax.random.normal(kx, (B, N, nfeat), jnp.float32)
    # random binary adjacency with self-loops
    adj = (jax.random.uniform(kadj, (B, N, N)) > 0.5).astype(jnp.float32)
    eye = jnp.eye(N, dtype=jnp.float32)[None, :, :]
    adj = jnp.maximum(adj, jnp.broadcast_to(eye, (B, N, N)))

    params = init_gat_params(kp, nfeat, nhid, nclass, nheads)
    ref = gat_reference(x, adj, params, alpha)

    # 1) exact-f32 path (single column tile per layer)
    fwd_f32 = jax.jit(functools.partial(gat_forward, alpha=alpha,
                                        use_bf16_mxu=False))
    out = jax.block_until_ready(fwd_f32(x, adj, params))
    assert out.shape == (B, N, nclass), out.shape
    assert bool(jnp.all(jnp.isfinite(out)))
    err = float(jnp.max(jnp.abs(out - ref)))
    assert err < 5e-2, f"f32 max abs err vs reference: {err}"

    # 2) multi-column-tile path (exercises the tiled softmax accumulation)
    out_t = jax.block_until_ready(
        gat_forward(x, adj, params, alpha=alpha, use_bf16_mxu=False,
                    col_tile=8))
    err_t = float(jnp.max(jnp.abs(out_t - ref)))
    assert err_t < 5e-2, f"tiled max abs err vs reference: {err_t}"

    # 3) bf16 MXU-operand path (recommended on v6e/v7x); loose sanity bound,
    #    full correctness is established by the two f32 checks above.
    out_bf = jax.block_until_ready(
        gat_forward(x, adj, params, alpha=alpha, use_bf16_mxu=True))
    assert bool(jnp.all(jnp.isfinite(out_bf)))
    err_bf = float(jnp.max(jnp.abs(out_bf - ref)))
    assert err_bf < 5e-1, f"bf16 max abs err vs reference: {err_bf}"

    print("KERNEL_OK")
</pallas_src>

<mosaic_0001>
module attributes {stable_mosaic.version = 11 : i64} {
  func.func @_gat_fused_kernel(%arg0: i32, %arg1: memref<32x16xf32, #tpu.memory_space<vmem>>, %arg2: memref<2x16x16xi8, #tpu.memory_space<vmem>>, %arg3: memref<16x20xf32, #tpu.memory_space<vmem>>, %arg4: memref<16x6xf32, #tpu.memory_space<vmem>>, %arg5: memref<2x16x4xf32, #tpu.memory_space<vmem>>, %arg6: memref<32x16xf32, #tpu.memory_space<vmem>>) attributes {dimension_semantics = [#tpu.dimension_semantics<parallel>], iteration_bounds = array<i64: 1>, scalar_prefetch = 0 : i64, scratch_operands = 1 : i64, tpu.core_type = #tpu.core_type<tc>, window_params = [{transform_indices = @transform_0, window_bounds = array<i64: 32, 16>}, {transform_indices = @transform_1, window_bounds = array<i64: 2, 16, 16>}, {pipeline_mode = #tpu.pipeline_mode<synchronous>, transform_indices = @transform_2, window_bounds = array<i64: 16, 20>}, {pipeline_mode = #tpu.pipeline_mode<synchronous>, transform_indices = @transform_3, window_bounds = array<i64: 16, 6>}, {transform_indices = @transform_4, window_bounds = array<i64: 2, 16, 4>}]} {
    %c0 = arith.constant 0 : index
    %c0_0 = arith.constant 0 : index
    %0 = vector.load %arg1[%c0, %c0_0] : memref<32x16xf32, #tpu.memory_space<vmem>>, vector<32x16xf32>
    %c0_1 = arith.constant 0 : index
    %c0_2 = arith.constant 0 : index
    %1 = vector.load %arg3[%c0_1, %c0_2] : memref<16x20xf32, #tpu.memory_space<vmem>>, vector<16x20xf32>
    %cst = arith.constant dense<0.000000e+00> : vector<32x20xf32>
    %2 = tpu.matmul %0, %1, %cst {dimension_numbers = #tpu.dot_dimension_numbers<[1], [0], [0], [1], [0, 0, 1, 1], [], []>} : vector<32x16xf32>, vector<16x20xf32>, vector<32x20xf32> -> vector<32x20xf32>
    %3 = vector.extract_strided_slice %2 {offsets = [0, 0], sizes = [16, 20], strides = [1, 1]} : vector<32x20xf32> to vector<16x20xf32>
    %4 = vector.extract_strided_slice %3 {offsets = [0, 18], sizes = [16, 2], strides = [1, 1]} : vector<16x20xf32> to vector<16x2xf32>
    %5 = tpu.transpose %4, [1, 0] : vector<16x2xf32> -> vector<2x16xf32>
    %6 = vector.extract_strided_slice %3 {offsets = [0, 0], sizes = [16, 8], strides = [1, 1]} : vector<16x20xf32> to vector<16x8xf32>
    %7 = vector.extract_strided_slice %3 {offsets = [0, 16], sizes = [16, 1], strides = [1, 1]} : vector<16x20xf32> to vector<16x1xf32>
    %8 = vector.extract_strided_slice %5 {offsets = [0, 0], sizes = [1, 16], strides = [1, 1]} : vector<2x16xf32> to vector<1x16xf32>
    %cst_3 = arith.constant 0.000000e+00 : f32
    %9 = vector.broadcast %cst_3 : f32 to vector<16x8xf32>
    %c0_4 = arith.constant 0 : index
    %c0_5 = arith.constant 0 : index
    %c0_6 = arith.constant 0 : index
    %10 = vector.load %arg2[%c0_4, %c0_5, %c0_6] : memref<2x16x16xi8, #tpu.memory_space<vmem>>, vector<1x16x16xi8>
    %11 = vector.shape_cast %10 : vector<1x16x16xi8> to vector<16x16xi8>
    %12 = arith.sitofp %11 : vector<16x16xi8> to vector<16x16xf32>
    %13 = vector.broadcast %7 : vector<16x1xf32> to vector<16x16xf32>
    %14 = vector.broadcast %8 : vector<1x16xf32> to vector<16x16xf32>
    %15 = arith.addf %13, %14 : vector<16x16xf32>
    %cst_7 = arith.constant 0.000000e+00 : f32
    %16 = vector.broadcast %cst_7 : f32 to vector<16x16xf32>
    %17 = arith.cmpf ogt, %15, %16 : vector<16x16xf32>
    %cst_8 = arith.constant 2.000000e-01 : f32
    %18 = vector.broadcast %cst_8 : f32 to vector<16x16xf32>
    %19 = arith.mulf %18, %15 : vector<16x16xf32>
    %20 = arith.select %17, %15, %19 : vector<16x16xi1>, vector<16x16xf32>
    %cst_9 = arith.constant 0.000000e+00 : f32
    %21 = vector.broadcast %cst_9 : f32 to vector<16x16xf32>
    %22 = arith.cmpf ogt, %12, %21 : vector<16x16xf32>
    %cst_10 = arith.constant -9.000000e+15 : f32
    %23 = vector.broadcast %cst_10 : f32 to vector<16x16xf32>
    %24 = arith.select %22, %20, %23 : vector<16x16xi1>, vector<16x16xf32>
    %cst_11 = arith.constant dense<0xFF800000> : vector<16xf32>
    %25 = vector.multi_reduction <maximumf>, %24, %cst_11 [0] : vector<16x16xf32> to vector<16xf32>
    %26 = vector.shape_cast %25 : vector<16xf32> to vector<1x16xf32>
    %27 = vector.broadcast %26 : vector<1x16xf32> to vector<16x16xf32>
    %28 = arith.subf %24, %27 : vector<16x16xf32>
    %29 = math.exp %28 : vector<16x16xf32>
    %cst_12 = arith.constant dense<0.000000e+00> : vector<16xf32>
    %30 = vector.multi_reduction <add>, %29, %cst_12 [0] : vector<16x16xf32> to vector<16xf32>
    %31 = vector.shape_cast %30 : vector<16xf32> to vector<1x16xf32>
    %32 = tpu.reciprocal %31 {approx = true} : vector<1x16xf32> -> vector<1x16xf32>
    %33 = vector.broadcast %32 : vector<1x16xf32> to vector<16x16xf32>
    %34 = arith.mulf %29, %33 : vector<16x16xf32>
    %cst_13 = arith.constant dense<0.000000e+00> : vector<16x8xf32>
    %35 = tpu.matmul %34, %6, %cst_13 {dimension_numbers = #tpu.dot_dimension_numbers<[1], [0], [0], [1], [0, 0, 1, 1], [], []>} : vector<16x16xf32>, vector<16x8xf32>, vector<16x8xf32> -> vector<16x8xf32>
    %36 = arith.addf %9, %35 : vector<16x8xf32>
    %cst_14 = arith.constant 0.000000e+00 : f32
    %37 = vector.broadcast %cst_14 : f32 to vector<16x8xf32>
    %38 = arith.cmpf ogt, %36, %37 : vector<16x8xf32>
    %39 = math.exp %36 : vector<16x8xf32>
    %cst_15 = arith.constant 1.000000e+00 : f32
    %40 = vector.broadcast %cst_15 : f32 to vector<16x8xf32>
    %41 = arith.subf %39, %40 : vector<16x8xf32>
    %42 = arith.select %38, %36, %41 : vector<16x8xi1>, vector<16x8xf32>
    %c0_16 = arith.constant 0 : index
    %c0_17 = arith.constant 0 : index
    %43 = vector.load %arg6[%c0_16, %c0_17] : memref<32x16xf32, #tpu.memory_space<vmem>>, vector<16x8xf32>
    tpu.vector_store %arg6[%c0_16, %c0_17], %42 {strides = array<i32>} : memref<32x16xf32, #tpu.memory_space<vmem>>, vector<16x8xf32>,
    %44 = vector.extract_strided_slice %3 {offsets = [0, 8], sizes = [16, 8], strides = [1, 1]} : vector<16x20xf32> to vector<16x8xf32>
    %45 = vector.extract_strided_slice %3 {offsets = [0, 17], sizes = [16, 1], strides = [1, 1]} : vector<16x20xf32> to vector<16x1xf32>
    %46 = vector.extract_strided_slice %5 {offsets = [1, 0], sizes = [1, 16], strides = [1, 1]} : vector<2x16xf32> to vector<1x16xf32>
    %cst_18 = arith.constant 0.000000e+00 : f32
    %47 = vector.broadcast %cst_18 : f32 to vector<16x8xf32>
    %c0_19 = arith.constant 0 : index
    %c0_20 = arith.constant 0 : index
    %c0_21 = arith.constant 0 : index
    %48 = vector.load %arg2[%c0_19, %c0_20, %c0_21] : memref<2x16x16xi8, #tpu.memory_space<vmem>>, vector<1x16x16xi8>
    %49 = vector.shape_cast %48 : vector<1x16x16xi8> to vector<16x16xi8>
    %50 = arith.sitofp %49 : vector<16x16xi8> to vector<16x16xf32>
    %51 = vector.broadcast %45 : vector<16x1xf32> to vector<16x16xf32>
    %52 = vector.broadcast %46 : vector<1x16xf32> to vector<16x16xf32>
    %53 = arith.addf %51, %52 : vector<16x16xf32>
    %cst_22 = arith.constant 0.000000e+00 : f32
    %54 = vector.broadcast %cst_22 : f32 to vector<16x16xf32>
    %55 = arith.cmpf ogt, %53, %54 : vector<16x16xf32>
    %cst_23 = arith.constant 2.000000e-01 : f32
    %56 = vector.broadcast %cst_23 : f32 to vector<16x16xf32>
    %57 = arith.mulf %56, %53 : vector<16x16xf32>
    %58 = arith.select %55, %53, %57 : vector<16x16xi1>, vector<16x16xf32>
    %cst_24 = arith.constant 0.000000e+00 : f32
    %59 = vector.broadcast %cst_24 : f32 to vector<16x16xf32>
    %60 = arith.cmpf ogt, %50, %59 : vector<16x16xf32>
    %cst_25 = arith.constant -9.000000e+15 : f32
    %61 = vector.broadcast %cst_25 : f32 to vector<16x16xf32>
    %62 = arith.select %60, %58, %61 : vector<16x16xi1>, vector<16x16xf32>
    %cst_26 = arith.constant dense<0xFF800000> : vector<16xf32>
    %63 = vector.multi_reduction <maximumf>, %62, %cst_26 [0] : vector<16x16xf32> to vector<16xf32>
    %64 = vector.shape_cast %63 : vector<16xf32> to vector<1x16xf32>
    %65 = vector.broadcast %64 : vector<1x16xf32> to vector<16x16xf32>
    %66 = arith.subf %62, %65 : vector<16x16xf32>
    %67 = math.exp %66 : vector<16x16xf32>
    %cst_27 = arith.constant dense<0.000000e+00> : vector<16xf32>
    %68 = vector.multi_reduction <add>, %67, %cst_27 [0] : vector<16x16xf32> to vector<16xf32>
    %69 = vector.shape_cast %68 : vector<16xf32> to vector<1x16xf32>
    %70 = tpu.reciprocal %69 {approx = true} : vector<1x16xf32> -> vector<1x16xf32>
    %71 = vector.broadcast %70 : vector<1x16xf32> to vector<16x16xf32>
    %72 = arith.mulf %67, %71 : vector<16x16xf32>
    %cst_28 = arith.constant dense<0.000000e+00> : vector<16x8xf32>
    %73 = tpu.matmul %72, %44, %cst_28 {dimension_numbers = #tpu.dot_dimension_numbers<[1], [0], [0], [1], [0, 0, 1, 1], [], []>} : vector<16x16xf32>, vector<16x8xf32>, vector<16x8xf32> -> vector<16x8xf32>
    %74 = arith.addf %47, %73 : vector<16x8xf32>
    %cst_29 = arith.constant 0.000000e+00 : f32
    %75 = vector.broadcast %cst_29 : f32 to vector<16x8xf32>
    %76 = arith.cmpf ogt, %74, %75 : vector<16x8xf32>
    %77 = math.exp %74 : vector<16x8xf32>
    %cst_30 = arith.constant 1.000000e+00 : f32
    %78 = vector.broadcast %cst_30 : f32 to vector<16x8xf32>
    %79 = arith.subf %77, %78 : vector<16x8xf32>
    %80 = arith.select %76, %74, %79 : vector<16x8xi1>, vector<16x8xf32>
    %c0_31 = arith.constant 0 : index
    %c8 = arith.constant 8 : index
    %81 = vector.load %arg6[%c0_31, %c8] : memref<32x16xf32, #tpu.memory_space<vmem>>, vector<16x8xf32>
    tpu.vector_store %arg6[%c0_31, %c8], %80 {strides = array<i32>} : memref<32x16xf32, #tpu.memory_space<vmem>>, vector<16x8xf32>,
    %82 = vector.extract_strided_slice %2 {offsets = [16, 0], sizes = [16, 20], strides = [1, 1]} : vector<32x20xf32> to vector<16x20xf32>
    %83 = vector.extract_strided_slice %82 {offsets = [0, 18], sizes = [16, 2], strides = [1, 1]} : vector<16x20xf32> to vector<16x2xf32>
    %84 = tpu.transpose %83, [1, 0] : vector<16x2xf32> -> vector<2x16xf32>
    %85 = vector.extract_strided_slice %82 {offsets = [0, 0], sizes = [16, 8], strides = [1, 1]} : vector<16x20xf32> to vector<16x8xf32>
    %86 = vector.extract_strided_slice %82 {offsets = [0, 16], sizes = [16, 1], strides = [1, 1]} : vector<16x20xf32> to vector<16x1xf32>
    %87 = vector.extract_strided_slice %84 {offsets = [0, 0], sizes = [1, 16], strides = [1, 1]} : vector<2x16xf32> to vector<1x16xf32>
    %cst_32 = arith.constant 0.000000e+00 : f32
    %88 = vector.broadcast %cst_32 : f32 to vector<16x8xf32>
    %c1 = arith.constant 1 : index
    %c0_33 = arith.constant 0 : index
    %c0_34 = arith.constant 0 : index
    %89 = vector.load %arg2[%c1, %c0_33, %c0_34] : memref<2x16x16xi8, #tpu.memory_space<vmem>>, vector<1x16x16xi8>
    %90 = vector.shape_cast %89 : vector<1x16x16xi8> to vector<16x16xi8>
    %91 = arith.sitofp %90 : vector<16x16xi8> to vector<16x16xf32>
    %92 = vector.broadcast %86 : vector<16x1xf32> to vector<16x16xf32>
    %93 = vector.broadcast %87 : vector<1x16xf32> to vector<16x16xf32>
    %94 = arith.addf %92, %93 : vector<16x16xf32>
    %cst_35 = arith.constant 0.000000e+00 : f32
    %95 = vector.broadcast %cst_35 : f32 to vector<16x16xf32>
    %96 = arith.cmpf ogt, %94, %95 : vector<16x16xf32>
    %cst_36 = arith.constant 2.000000e-01 : f32
    %97 = vector.broadcast %cst_36 : f32 to vector<16x16xf32>
    %98 = arith.mulf %97, %94 : vector<16x16xf32>
    %99 = arith.select %96, %94, %98 : vector<16x16xi1>, vector<16x16xf32>
    %cst_37 = arith.constant 0.000000e+00 : f32
    %100 = vector.broadcast %cst_37 : f32 to vector<16x16xf32>
    %101 = arith.cmpf ogt, %91, %100 : vector<16x16xf32>
    %cst_38 = arith.constant -9.000000e+15 : f32
    %102 = vector.broadcast %cst_38 : f32 to vector<16x16xf32>
    %103 = arith.select %101, %99, %102 : vector<16x16xi1>, vector<16x16xf32>
    %cst_39 = arith.constant dense<0xFF800000> : vector<16xf32>
    %104 = vector.multi_reduction <maximumf>, %103, %cst_39 [0] : vector<16x16xf32> to vector<16xf32>
    %105 = vector.shape_cast %104 : vector<16xf32> to vector<1x16xf32>
    %106 = vector.broadcast %105 : vector<1x16xf32> to vector<16x16xf32>
    %107 = arith.subf %103, %106 : vector<16x16xf32>
    %108 = math.exp %107 : vector<16x16xf32>
    %cst_40 = arith.constant dense<0.000000e+00> : vector<16xf32>
    %109 = vector.multi_reduction <add>, %108, %cst_40 [0] : vector<16x16xf32> to vector<16xf32>
    %110 = vector.shape_cast %109 : vector<16xf32> to vector<1x16xf32>
    %111 = tpu.reciprocal %110 {approx = true} : vector<1x16xf32> -> vector<1x16xf32>
    %112 = vector.broadcast %111 : vector<1x16xf32> to vector<16x16xf32>
    %113 = arith.mulf %108, %112 : vector<16x16xf32>
    %cst_41 = arith.constant dense<0.000000e+00> : vector<16x8xf32>
    %114 = tpu.matmul %113, %85, %cst_41 {dimension_numbers = #tpu.dot_dimension_numbers<[1], [0], [0], [1], [0, 0, 1, 1], [], []>} : vector<16x16xf32>, vector<16x8xf32>, vector<16x8xf32> -> vector<16x8xf32>
    %115 = arith.addf %88, %114 : vector<16x8xf32>
    %cst_42 = arith.constant 0.000000e+00 : f32
    %116 = vector.broadcast %cst_42 : f32 to vector<16x8xf32>
    %117 = arith.cmpf ogt, %115, %116 : vector<16x8xf32>
    %118 = math.exp %115 : vector<16x8xf32>
    %cst_43 = arith.constant 1.000000e+00 : f32
    %119 = vector.broadcast %cst_43 : f32 to vector<16x8xf32>
    %120 = arith.subf %118, %119 : vector<16x8xf32>
    %121 = arith.select %117, %115, %120 : vector<16x8xi1>, vector<16x8xf32>
    %c16 = arith.constant 16 : index
    %c0_44 = arith.constant 0 : index
    %122 = vector.load %arg6[%c16, %c0_44] : memref<32x16xf32, #tpu.memory_space<vmem>>, vector<16x8xf32>
    tpu.vector_store %arg6[%c16, %c0_44], %121 {strides = array<i32>} : memref<32x16xf32, #tpu.memory_space<vmem>>, vector<16x8xf32>,
    %123 = vector.extract_strided_slice %82 {offsets = [0, 8], sizes = [16, 8], strides = [1, 1]} : vector<16x20xf32> to vector<16x8xf32>
    %124 = vector.extract_strided_slice %82 {offsets = [0, 17], sizes = [16, 1], strides = [1, 1]} : vector<16x20xf32> to vector<16x1xf32>
    %125 = vector.extract_strided_slice %84 {offsets = [1, 0], sizes = [1, 16], strides = [1, 1]} : vector<2x16xf32> to vector<1x16xf32>
    %cst_45 = arith.constant 0.000000e+00 : f32
    %126 = vector.broadcast %cst_45 : f32 to vector<16x8xf32>
    %c1_46 = arith.constant 1 : index
    %c0_47 = arith.constant 0 : index
    %c0_48 = arith.constant 0 : index
    %127 = vector.load %arg2[%c1_46, %c0_47, %c0_48] : memref<2x16x16xi8, #tpu.memory_space<vmem>>, vector<1x16x16xi8>
    %128 = vector.shape_cast %127 : vector<1x16x16xi8> to vector<16x16xi8>
    %129 = arith.sitofp %128 : vector<16x16xi8> to vector<16x16xf32>
    %130 = vector.broadcast %124 : vector<16x1xf32> to vector<16x16xf32>
    %131 = vector.broadcast %125 : vector<1x16xf32> to vector<16x16xf32>
    %132 = arith.addf %130, %131 : vector<16x16xf32>
    %cst_49 = arith.constant 0.000000e+00 : f32
    %133 = vector.broadcast %cst_49 : f32 to vector<16x16xf32>
    %134 = arith.cmpf ogt, %132, %133 : vector<16x16xf32>
    %cst_50 = arith.constant 2.000000e-01 : f32
    %135 = vector.broadcast %cst_50 : f32 to vector<16x16xf32>
    %136 = arith.mulf %135, %132 : vector<16x16xf32>
    %137 = arith.select %134, %132, %136 : vector<16x16xi1>, vector<16x16xf32>
    %cst_51 = arith.constant 0.000000e+00 : f32
    %138 = vector.broadcast %cst_51 : f32 to vector<16x16xf32>
    %139 = arith.cmpf ogt, %129, %138 : vector<16x16xf32>
    %cst_52 = arith.constant -9.000000e+15 : f32
    %140 = vector.broadcast %cst_52 : f32 to vector<16x16xf32>
    %141 = arith.select %139, %137, %140 : vector<16x16xi1>, vector<16x16xf32>
    %cst_53 = arith.constant dense<0xFF800000> : vector<16xf32>
    %142 = vector.multi_reduction <maximumf>, %141, %cst_53 [0] : vector<16x16xf32> to vector<16xf32>
    %143 = vector.shape_cast %142 : vector<16xf32> to vector<1x16xf32>
    %144 = vector.broadcast %143 : vector<1x16xf32> to vector<16x16xf32>
    %145 = arith.subf %141, %144 : vector<16x16xf32>
    %146 = math.exp %145 : vector<16x16xf32>
    %cst_54 = arith.constant dense<0.000000e+00> : vector<16xf32>
    %147 = vector.multi_reduction <add>, %146, %cst_54 [0] : vector<16x16xf32> to vector<16xf32>
    %148 = vector.shape_cast %147 : vector<16xf32> to vector<1x16xf32>
    %149 = tpu.reciprocal %148 {approx = true} : vector<1x16xf32> -> vector<1x16xf32>
    %150 = vector.broadcast %149 : vector<1x16xf32> to vector<16x16xf32>
    %151 = arith.mulf %146, %150 : vector<16x16xf32>
    %cst_55 = arith.constant dense<0.000000e+00> : vector<16x8xf32>
    %152 = tpu.matmul %151, %123, %cst_55 {dimension_numbers = #tpu.dot_dimension_numbers<[1], [0], [0], [1], [0, 0, 1, 1], [], []>} : vector<16x16xf32>, vector<16x8xf32>, vector<16x8xf32> -> vector<16x8xf32>
    %153 = arith.addf %126, %152 : vector<16x8xf32>
    %cst_56 = arith.constant 0.000000e+00 : f32
    %154 = vector.broadcast %cst_56 : f32 to vector<16x8xf32>
    %155 = arith.cmpf ogt, %153, %154 : vector<16x8xf32>
    %156 = math.exp %153 : vector<16x8xf32>
    %cst_57 = arith.constant 1.000000e+00 : f32
    %157 = vector.broadcast %cst_57 : f32 to vector<16x8xf32>
    %158 = arith.subf %156, %157 : vector<16x8xf32>
    %159 = arith.select %155, %153, %158 : vector<16x8xi1>, vector<16x8xf32>
    %c16_58 = arith.constant 16 : index
    %c8_59 = arith.constant 8 : index
    %160 = vector.load %arg6[%c16_58, %c8_59] : memref<32x16xf32, #tpu.memory_space<vmem>>, vector<16x8xf32>
    tpu.vector_store %arg6[%c16_58, %c8_59], %159 {strides = array<i32>} : memref<32x16xf32, #tpu.memory_space<vmem>>, vector<16x8xf32>,
    %c0_60 = arith.constant 0 : index
    %c0_61 = arith.constant 0 : index
    %161 = vector.load %arg6[%c0_60, %c0_61] : memref<32x16xf32, #tpu.memory_space<vmem>>, vector<32x16xf32>
    %c0_62 = arith.constant 0 : index
    %c0_63 = arith.constant 0 : index
    %162 = vector.load %arg4[%c0_62, %c0_63] : memref<16x6xf32, #tpu.memory_space<vmem>>, vector<16x6xf32>
    %cst_64 = arith.constant dense<0.000000e+00> : vector<32x6xf32>
    %163 = tpu.matmul %161, %162, %cst_64 {dimension_numbers = #tpu.dot_dimension_numbers<[1], [0], [0], [1], [0, 0, 1, 1], [], []>} : vector<32x16xf32>, vector<16x6xf32>, vector<32x6xf32> -> vector<32x6xf32>
    %164 = vector.extract_strided_slice %163 {offsets = [0, 0], sizes = [16, 6], strides = [1, 1]} : vector<32x6xf32> to vector<16x6xf32>
    %165 = vector.extract_strided_slice %164 {offsets = [0, 0], sizes = [16, 4], strides = [1, 1]} : vector<16x6xf32> to vector<16x4xf32>
    %166 = vector.extract_strided_slice %164 {offsets = [0, 4], sizes = [16, 1], strides = [1, 1]} : vector<16x6xf32> to vector<16x1xf32>
    %167 = vector.extract_strided_slice %164 {offsets = [0, 5], sizes = [16, 1], strides = [1, 1]} : vector<16x6xf32> to vector<16x1xf32>
    %168 = tpu.transpose %167, [1, 0] : vector<16x1xf32> -> vector<1x16xf32>
    %cst_65 = arith.constant 0.000000e+00 : f32
    %169 = vector.broadcast %cst_65 : f32 to vector<16x4xf32>
    %c0_66 = arith.constant 0 : index
    %c0_67 = arith.constant 0 : index
    %c0_68 = arith.constant 0 : index
    %170 = vector.load %arg2[%c0_66, %c0_67, %c0_68] : memref<2x16x16xi8, #tpu.memory_space<vmem>>, vector<1x16x16xi8>
    %171 = vector.shape_cast %170 : vector<1x16x16xi8> to vector<16x16xi8>
    %172 = arith.sitofp %171 : vector<16x16xi8> to vector<16x16xf32>
    %173 = vector.broadcast %166 : vector<16x1xf32> to vector<16x16xf32>
    %174 = vector.broadcast %168 : vector<1x16xf32> to vector<16x16xf32>
    %175 = arith.addf %173, %174 : vector<16x16xf32>
    %cst_69 = arith.constant 0.000000e+00 : f32
    %176 = vector.broadcast %cst_69 : f32 to vector<16x16xf32>
    %177 = arith.cmpf ogt, %175, %176 : vector<16x16xf32>
    %cst_70 = arith.constant 2.000000e-01 : f32
    %178 = vector.broadcast %cst_70 : f32 to vector<16x16xf32>
    %179 = arith.mulf %178, %175 : vector<16x16xf32>
    %180 = arith.select %177, %175, %179 : vector<16x16xi1>, vector<16x16xf32>
    %cst_71 = arith.constant 0.000000e+00 : f32
    %181 = vector.broadcast %cst_71 : f32 to vector<16x16xf32>
    %182 = arith.cmpf ogt, %172, %181 : vector<16x16xf32>
    %cst_72 = arith.constant -9.000000e+15 : f32
    %183 = vector.broadcast %cst_72 : f32 to vector<16x16xf32>
    %184 = arith.select %182, %180, %183 : vector<16x16xi1>, vector<16x16xf32>
    %cst_73 = arith.constant dense<0xFF800000> : vector<16xf32>
    %185 = vector.multi_reduction <maximumf>, %184, %cst_73 [0] : vector<16x16xf32> to vector<16xf32>
    %186 = vector.shape_cast %185 : vector<16xf32> to vector<1x16xf32>
    %187 = vector.broadcast %186 : vector<1x16xf32> to vector<16x16xf32>
    %188 = arith.subf %184, %187 : vector<16x16xf32>
    %189 = math.exp %188 : vector<16x16xf32>
    %cst_74 = arith.constant dense<0.000000e+00> : vector<16xf32>
    %190 = vector.multi_reduction <add>, %189, %cst_74 [0] : vector<16x16xf32> to vector<16xf32>
    %191 = vector.shape_cast %190 : vector<16xf32> to vector<1x16xf32>
    %192 = tpu.reciprocal %191 {approx = true} : vector<1x16xf32> -> vector<1x16xf32>
    %193 = vector.broadcast %192 : vector<1x16xf32> to vector<16x16xf32>
    %194 = arith.mulf %189, %193 : vector<16x16xf32>
    %cst_75 = arith.constant dense<0.000000e+00> : vector<16x4xf32>
    %195 = tpu.matmul %194, %165, %cst_75 {dimension_numbers = #tpu.dot_dimension_numbers<[1], [0], [0], [1], [0, 0, 1, 1], [], []>} : vector<16x16xf32>, vector<16x4xf32>, vector<16x4xf32> -> vector<16x4xf32>
    %196 = arith.addf %169, %195 : vector<16x4xf32>
    %cst_76 = arith.constant 0.000000e+00 : f32
    %197 = vector.broadcast %cst_76 : f32 to vector<16x4xf32>
    %198 = arith.cmpf ogt, %196, %197 : vector<16x4xf32>
    %199 = math.exp %196 : vector<16x4xf32>
    %cst_77 = arith.constant 1.000000e+00 : f32
    %200 = vector.broadcast %cst_77 : f32 to vector<16x4xf32>
    %201 = arith.subf %199, %200 : vector<16x4xf32>
    %202 = arith.select %198, %196, %201 : vector<16x4xi1>, vector<16x4xf32>
    %c0_78 = arith.constant 0 : index
    %c0_79 = arith.constant 0 : index
    %c0_80 = arith.constant 0 : index
    %203 = vector.load %arg5[%c0_78, %c0_79, %c0_80] : memref<2x16x4xf32, #tpu.memory_space<vmem>>, vector<1x16x4xf32>
    %204 = vector.shape_cast %203 : vector<1x16x4xf32> to vector<16x4xf32>
    %205 = vector.shape_cast %202 : vector<16x4xf32> to vector<1x16x4xf32>
    tpu.vector_store %arg5[%c0_78, %c0_79, %c0_80], %205 {strides = array<i32>} : memref<2x16x4xf32, #tpu.memory_space<vmem>>, vector<1x16x4xf32>,
    %206 = vector.extract_strided_slice %163 {offsets = [16, 0], sizes = [16, 6], strides = [1, 1]} : vector<32x6xf32> to vector<16x6xf32>
    %207 = vector.extract_strided_slice %206 {offsets = [0, 0], sizes = [16, 4], strides = [1, 1]} : vector<16x6xf32> to vector<16x4xf32>
    %208 = vector.extract_strided_slice %206 {offsets = [0, 4], sizes = [16, 1], strides = [1, 1]} : vector<16x6xf32> to vector<16x1xf32>
    %209 = vector.extract_strided_slice %206 {offsets = [0, 5], sizes = [16, 1], strides = [1, 1]} : vector<16x6xf32> to vector<16x1xf32>
    %210 = tpu.transpose %209, [1, 0] : vector<16x1xf32> -> vector<1x16xf32>
    %cst_81 = arith.constant 0.000000e+00 : f32
    %211 = vector.broadcast %cst_81 : f32 to vector<16x4xf32>
    %c1_82 = arith.constant 1 : index
    %c0_83 = arith.constant 0 : index
    %c0_84 = arith.constant 0 : index
    %212 = vector.load %arg2[%c1_82, %c0_83, %c0_84] : memref<2x16x16xi8, #tpu.memory_space<vmem>>, vector<1x16x16xi8>
    %213 = vector.shape_cast %212 : vector<1x16x16xi8> to vector<16x16xi8>
    %214 = arith.sitofp %213 : vector<16x16xi8> to vector<16x16xf32>
    %215 = vector.broadcast %208 : vector<16x1xf32> to vector<16x16xf32>
    %216 = vector.broadcast %210 : vector<1x16xf32> to vector<16x16xf32>
    %217 = arith.addf %215, %216 : vector<16x16xf32>
    %cst_85 = arith.constant 0.000000e+00 : f32
    %218 = vector.broadcast %cst_85 : f32 to vector<16x16xf32>
    %219 = arith.cmpf ogt, %217, %218 : vector<16x16xf32>
    %cst_86 = arith.constant 2.000000e-01 : f32
    %220 = vector.broadcast %cst_86 : f32 to vector<16x16xf32>
    %221 = arith.mulf %220, %217 : vector<16x16xf32>
    %222 = arith.select %219, %217, %221 : vector<16x16xi1>, vector<16x16xf32>
    %cst_87 = arith.constant 0.000000e+00 : f32
    %223 = vector.broadcast %cst_87 : f32 to vector<16x16xf32>
    %224 = arith.cmpf ogt, %214, %223 : vector<16x16xf32>
    %cst_88 = arith.constant -9.000000e+15 : f32
    %225 = vector.broadcast %cst_88 : f32 to vector<16x16xf32>
    %226 = arith.select %224, %222, %225 : vector<16x16xi1>, vector<16x16xf32>
    %cst_89 = arith.constant dense<0xFF800000> : vector<16xf32>
    %227 = vector.multi_reduction <maximumf>, %226, %cst_89 [0] : vector<16x16xf32> to vector<16xf32>
    %228 = vector.shape_cast %227 : vector<16xf32> to vector<1x16xf32>
    %229 = vector.broadcast %228 : vector<1x16xf32> to vector<16x16xf32>
    %230 = arith.subf %226, %229 : vector<16x16xf32>
    %231 = math.exp %230 : vector<16x16xf32>
    %cst_90 = arith.constant dense<0.000000e+00> : vector<16xf32>
    %232 = vector.multi_reduction <add>, %231, %cst_90 [0] : vector<16x16xf32> to vector<16xf32>
    %233 = vector.shape_cast %232 : vector<16xf32> to vector<1x16xf32>
    %234 = tpu.reciprocal %233 {approx = true} : vector<1x16xf32> -> vector<1x16xf32>
    %235 = vector.broadcast %234 : vector<1x16xf32> to vector<16x16xf32>
    %236 = arith.mulf %231, %235 : vector<16x16xf32>
    %cst_91 = arith.constant dense<0.000000e+00> : vector<16x4xf32>
    %237 = tpu.matmul %236, %207, %cst_91 {dimension_numbers = #tpu.dot_dimension_numbers<[1], [0], [0], [1], [0, 0, 1, 1], [], []>} : vector<16x16xf32>, vector<16x4xf32>, vector<16x4xf32> -> vector<16x4xf32>
    %238 = arith.addf %211, %237 : vector<16x4xf32>
    %cst_92 = arith.constant 0.000000e+00 : f32
    %239 = vector.broadcast %cst_92 : f32 to vector<16x4xf32>
    %240 = arith.cmpf ogt, %238, %239 : vector<16x4xf32>
    %241 = math.exp %238 : vector<16x4xf32>
    %cst_93 = arith.constant 1.000000e+00 : f32
    %242 = vector.broadcast %cst_93 : f32 to vector<16x4xf32>
    %243 = arith.subf %241, %242 : vector<16x4xf32>
    %244 = arith.select %240, %238, %243 : vector<16x4xi1>, vector<16x4xf32>
    %c1_94 = arith.constant 1 : index
    %c0_95 = arith.constant 0 : index
    %c0_96 = arith.constant 0 : index
    %245 = vector.load %arg5[%c1_94, %c0_95, %c0_96] : memref<2x16x4xf32, #tpu.memory_space<vmem>>, vector<1x16x4xf32>
    %246 = vector.shape_cast %245 : vector<1x16x4xf32> to vector<16x4xf32>
    %247 = vector.shape_cast %244 : vector<16x4xf32> to vector<1x16x4xf32>
    tpu.vector_store %arg5[%c1_94, %c0_95, %c0_96], %247 {strides = array<i32>} : memref<2x16x4xf32, #tpu.memory_space<vmem>>, vector<1x16x4xf32>,
    return
  }
  func.func @transform_0(%arg0: i32) -> (i32, i32) {
    %c0_i32 = arith.constant 0 : i32
    %c0_i32_0 = arith.constant 0 : i32
    return %arg0, %c0_i32 : i32, i32
  }
  func.func @transform_1(%arg0: i32) -> (i32, i32, i32) {
    %c0_i32 = arith.constant 0 : i32
    %c0_i32_0 = arith.constant 0 : i32
    %c0_i32_1 = arith.constant 0 : i32
    return %arg0, %c0_i32, %c0_i32_0 : i32, i32, i32
  }
  func.func @transform_2(%arg0: i32) -> (i32, i32) {
    %c0_i32 = arith.constant 0 : i32
    %c0_i32_0 = arith.constant 0 : i32
    %c0_i32_1 = arith.constant 0 : i32
    return %c0_i32, %c0_i32_0 : i32, i32
  }
  func.func @transform_3(%arg0: i32) -> (i32, i32) {
    %c0_i32 = arith.constant 0 : i32
    %c0_i32_0 = arith.constant 0 : i32
    %c0_i32_1 = arith.constant 0 : i32
    return %c0_i32, %c0_i32_0 : i32, i32
  }
  func.func @transform_4(%arg0: i32) -> (i32, i32, i32) {
    %c0_i32 = arith.constant 0 : i32
    %c0_i32_0 = arith.constant 0 : i32
    %c0_i32_1 = arith.constant 0 : i32
    return %arg0, %c0_i32, %c0_i32_0 : i32, i32, i32
  }
}

</mosaic_0001>

<bundles_post_ra>
// kernel: gat_forward.1
= control target key start
LH: loop header
LB: loop body
LE: loop exit
PB: predicated region body
PF: predicated region fallthrough
CT: control target
= control target key end

     0   :  { %v1037_v2 = vmov 17   ;;  %vm23_vm0 = vcmask 130048   ;;  %v1038_v7 = vmov 16   ;;  %s1039_s26 = smov 110   ;;  %s1041_s5 = smov 8   ;;  %s1198_s2 = inlined_call_operand.vmem [shape: f32[16,20], index: 2, kind: input, shape index: {}]   ;;  %s1199_s0 = inlined_call_operand.vmem [shape: f32[32,16], index: 0, kind: input, shape index: {}]   ;;  %s1200_s1 = inlined_call_operand.vmem [shape: s8[2,16,16], index: 1, kind: input, shape index: {}]   ;;  %s1201_s3 = inlined_call_operand.vmem [shape: f32[16,6], index: 3, kind: input, shape index: {}]   ;;  %s1202_s4 = inlined_call_operand.vmem [shape: f32[2,16,4], index: 4, kind: output, shape index: {}]  }
   0x1   :  { %v22_v0 = vld [vmem:[%s1198_s2 + $0x8] sm:$0xff]  ;;  %v21_v1 = vld [vmem:[%s1198_s2] sm:$0xff]  ;;  %958 = vset.pattern.permute.xlu1 %v1037_v2  ;;  %v20_v4 = vld [vmem:[%s1199_s0 + $0x18] sm:$0xff]  ;;  %959 = vset.pattern.permute.xlu0 %v1038_v7 }
   0x2   :  { %50 = vmatpush.msra.mxu0 %v22_v0  ;;  %v17_v3 = vld [vmem:[%s1199_s0] sm:$0xff]  ;;  %943 = vmatpush.msra.mxu1 %v22_v0  ;;  %v18_v5 = vld [vmem:[%s1199_s0 + $0x8] sm:$0xff]  ;;  %v19_v6 = vld [vmem:[%s1199_s0 + $0x10] sm:$0xff]  ;;  %s1040_s0 = smov 120  }
   0x3   :  { %v920_v30 = vld [vmem:[%s1200_s1] sm:$0xff]  }
   0x4   :  { %51 = vmatpush.msra.mxu0 %v21_v1  ;;  %944 = vmatpush.msra.mxu1 %v21_v1  ;;  %v1101_v31 = vld [vmem:[%s1200_s1] sm:$0xff]   ;;  %v921_v32 = vunpack.c.0.s8 %v920_v30  ;;  %v922_v34 = vunpack.c.1.s8 %v920_v30  ;;  %v933_v44 = vunpack.c.2.s8 %v920_v30  ;;  %v934_v49 = vunpack.c.3.s8 %v920_v30 }
   0x5   :  { %879 = vmatmul.msk.f32.vlgmr.msra.gmra.mxu0 %vm23_vm0, %v17_v3  ;;  %882 = vmatmul.msk.f32.vlgmr.msra.gmra.mxu1 %vm23_vm0, %v20_v4  ;;  %v925_v35 = vunpack.c.0.s8 %v1101_v31  ;;  %v926_v36 = vunpack.c.1.s8 %v1101_v31 }
   0x6   :  { %v109_v37 = vcvt.s32.f32 %v921_v32  ;;  %v110_v38 = vcvt.s32.f32 %v922_v34  ;;  %v451_v57 = vcvt.s32.f32 %v933_v44 }
   0x7   :  { %v205_v39 = vcvt.s32.f32 %v925_v35  ;;  %v206_v40 = vcvt.s32.f32 %v926_v36 }
   0x8   :  { %vm128_vm1 = vcmp.gt.f32.partialorder %v109_v37, 0.0  ;;  %vm129_vm2 = vcmp.gt.f32.partialorder %v110_v38, 0.0  ;;  %vm470_vm9 = vcmp.gt.f32.partialorder %v451_v57, 0.0 }
   0x9   :  { %vm224_vm3 = vcmp.gt.f32.partialorder %v205_v39, 0.0  ;;  %vm225_vm4 = vcmp.gt.f32.partialorder %v206_v40, 0.0 }
   0xd   :  { %880 = vmatmul.msk.f32.gmra.mxu0 %vm23_vm0, %v18_v5 }
  0x15   :  { %881 = vmatmul.msk.f32.gmra.mxu0 %vm23_vm0, %v19_v6  ;;  %v452_v6 = vcvt.s32.f32 %v934_v49 }
  0x17   :  { %vm471_vm12 = vcmp.gt.f32.partialorder %v452_v6, 0.0 }
  0x82   :  { %v53_v8 = vpop.f32.mrf.mxu0  ;;  %v62_v9 = vpop.f32.mrf.mxu1 }
  0x83   :  { %208 = vperm.xlu1 %958, %v53_v8   ;;  %67 = vrot.lane.b32.xlu0 %v53_v8, %s1039_s26 }
  0x84   :  { %315 = vrot.lane.b32.xlu2 %v62_v9, %s1039_s26 }
  0x8a   :  { %v56_v10 = vpop.f32.mrf.mxu0 }
  0x8b   :  { %212 = vperm.xlu1 %958, %v56_v10   ;;  %69 = vrot.lane.b32.xlu0 %v56_v10, %s1039_s26  ;;  %v963_v12 = vpack.i.bf16 %v53_v8, %v56_v10 }
  0x8c   :  { %179 = vmatpush.msrb.mxu1 %v56_v10 }
  0x8e   :  { %180 = vmatpush.msrb.mxu1 %v53_v8 }
  0x92   :  { %v59_v11 = vpop.f32.mrf.mxu0 }
  0x93   :  { %961 = vset.pattern.permute.xlu1 %v1038_v7  ;;  %112 = vperm.xlu0 %959, %v53_v8   ;;  %v970_v13 = vpack.i.bf16 %v59_v11, %v62_v9 }
  0x94   :  { %313 = vrot.lane.b32.xlu2 %v59_v11, %s1039_s26  ;;  %116 = vperm.xlu1 %961, %v56_v10  }
  0x9b   :  { %960 = vset.pattern.permute.xlu0 %v1037_v2 }
  0x9c   :  { %458 = vperm.xlu0 %960, %v62_v9   ;;  %962 = vset.pattern.permute.xlu1 %v1037_v2 }
  0x9d   :  { %454 = vperm.xlu1 %962, %v59_v11  }
  0xa4   :  { %964 = vrot.lane.b32.xlu0 %v963_v12, %s1040_s0 }
  0xa5   :  { %968 = vset.pattern.permute.xlu0 %v1038_v7 }
  0xac   :  { %359 = vperm.xlu0 %968, %v59_v11  }
  0xb4   :  { %971 = vrot.lane.b32.xlu0 %v970_v13, %s1040_s0 }
  0xde   :  { %v316_v14 = vpop.permute.xlu2 %315 }
  0xee   :  { %v314_v15 = vpop.permute.xlu2 %313 }
  0xef   :  { %319 = vxpose.xlu1.b32.start [1/2] (short) (narrow) %v314_v15, 8 }
  0xf5   :  { %v68_v16 = vpop.permute.xlu0 %67  ;;  %v209_v27 = vpop.permute.xlu1 %208 }
  0xf6   :  { %73 = vxpose.xlu2.b32.start [1/2] (short) (narrow) %v68_v16, 8 }
  0xf7   :  { %320 = vxpose.xlu1.b32.end [2/2] (short) (narrow) %v316_v14, 8 }
  0xfd   :  { %v70_v17 = vpop.permute.xlu0 %69  ;;  %v213_v28 = vpop.permute.xlu1 %212 }
  0xfe   :  { %74 = vxpose.xlu2.b32.end [2/2] (short) (narrow) %v70_v17, 8 }
 0x105   :  { %v113_v18 = vpop.permute.xlu0 %112 }
 0x106   :  { %v117_v29 = vpop.permute.xlu1 %116 }
 0x10e   :  { %v1091_v19 = vpop.permute.xlu0 %458 }
 0x10f   :  { %v455_v33 = vpop.permute.xlu1 %454 }
 0x116   :  { %v965_v20 = vpop.permute.xlu0 %964 }
 0x117   :  { %v966_v21 = vunpack.i.l.bf16 %v965_v20  ;;  %v967_v22 = vunpack.i.h.bf16 %v965_v20 }
 0x119   :  { %281 = vmatpush.msra.mxu2 %v966_v21  ;;  %945 = vmatpush.msra.mxu3 %v966_v21 }
 0x11b   :  { %282 = vmatpush.msra.mxu2 %v967_v22  ;;  %946 = vmatpush.msra.mxu3 %v967_v22 }
 0x11d   :  { %426 = vmatpush.msrb.mxu3 %v62_v9 }
 0x11e   :  { %v1093_v23 = vpop.permute.xlu0 %359 }
 0x11f   :  { %427 = vmatpush.msrb.mxu3 %v59_v11 }
 0x126   :  { %v972_v24 = vpop.permute.xlu0 %971 }
 0x127   :  { %v973_v25 = vunpack.i.l.bf16 %v972_v24  ;;  %v974_v26 = vunpack.i.h.bf16 %v972_v24 }
 0x129   :  { %527 = vmatpush.msra.mxu1 %v973_v25 }
 0x12b   :  { %528 = vmatpush.msra.mxu1 %v974_v26 }
 0x160   :  { %969 = vset.pattern.permute.xlu2 %v1038_v7 }
 0x167   :  { %363 = vperm.xlu2 %969, %v62_v9  }
 0x18f   :  { %v89_v41 = vpop.trf.xlu2 }
 0x190   :  { %v119_v42 = vperm.slane %v89_v41, 0  ;;  %v215_v43 = vperm.slane %v89_v41, 1 }
 0x192   :  { %v120_v45 = vadd.f32 %v119_v42, %v113_v18  ;;  %v121_v46 = vadd.f32 %v119_v42, %v117_v29  ;;  %v216_v47 = vadd.f32 %v215_v43, %v209_v27  ;;  %v217_v48 = vadd.f32 %v215_v43, %v213_v28 }
 0x193   :  { %v1105_v50 = vpop.trf.xlu1 }
 0x194   :  { %vm122_vm5 = vcmp.gt.f32.partialorder %v120_v45, 0.0  ;;  %vm123_vm6 = vcmp.gt.f32.partialorder %v121_v46, 0.0  ;;  %v124_v51 = vmul.f32 0.2, %v120_v45  ;;  %v125_v52 = vmul.f32 0.2, %v121_v46 }
 0x195   :  { %vm218_vm7 = vcmp.gt.f32.partialorder %v216_v47, 0.0  ;;  %vm219_vm8 = vcmp.gt.f32.partialorder %v217_v48, 0.0  ;;  %v220_v53 = vmul.f32 0.2, %v216_v47  ;;  %v221_v54 = vmul.f32 0.2, %v217_v48 }
 0x196   :  { %v126_v55 = vsel %vm122_vm5, %v120_v45, %v124_v51  ;;  %v127_v56 = vsel %vm123_vm6, %v121_v46, %v125_v52  ;;  %v461_v58 = vperm.slane %v1105_v50, 1 }
 0x197   :  { %v130_v59 = vsel %vm128_vm1, %v126_v55, -9e+15  ;;  %v131_v60 = vsel %vm129_vm2, %v127_v56, -9e+15  ;;  %v222_v61 = vsel %vm218_vm7, %v216_v47, %v220_v53  ;;  %v223_v62 = vsel %vm219_vm8, %v217_v48, %v221_v54 }
 0x198   :  { %v132_v63 = vsel %vm23_vm0, %v130_v59, -inf  ;;  %v133_v0 = vsel %vm23_vm0, %v131_v60, -inf  ;;  %v226_v1 = vsel %vm224_vm3, %v222_v61, -9e+15  ;;  %v227_v2 = vsel %vm225_vm4, %v223_v62, -9e+15 }
 0x199   :  { %v134_v3 = vmax.f32 %v132_v63, %v133_v0  ;;  %v228_v4 = vsel %vm23_vm0, %v226_v1, -inf  ;;  %v229_v5 = vsel %vm23_vm0, %v227_v2, -inf  ;;  %v462_v8 = vadd.f32 %v461_v58, %v455_v33 }
 0x19a   :  { %v230_v7 = vmax.f32 %v228_v4, %v229_v5  ;;  %v463_v9 = vadd.f32 %v461_v58, %v1091_v19  ;;  %v366_v61 = vperm.slane %v1105_v50, 0  ;;  %vm198_vm2 = vcmask 64512  }
 0x19b   :  { %v135_v10 = vrot.slane %v134_v3, 4  ;;  %vm464_vm10 = vcmp.gt.f32.partialorder %v462_v8, 0.0  ;;  %v466_v12 = vmul.f32 0.2, %v462_v8 }
 0x19c   :  { %v231_v11 = vrot.slane %v230_v7, 4  ;;  %vm465_vm11 = vcmp.gt.f32.partialorder %v463_v9, 0.0  ;;  %v467_v14 = vmul.f32 0.2, %v463_v9  ;;  %v367_v4 = vadd.f32 %v366_v61, %v1093_v23 }
 0x19d   :  { %v136_v13 = vmax.f32 %v134_v3, %v135_v10  ;;  %v468_v16 = vsel %vm464_vm10, %v462_v8, %v466_v12 }
 0x19e   :  { %v232_v15 = vmax.f32 %v230_v7, %v231_v11  ;;  %v469_v18 = vsel %vm465_vm11, %v463_v9, %v467_v14  ;;  %v472_v20 = vsel %vm470_vm9, %v468_v16, -9e+15  ;;  %v930_v9 = vunpack.c.3.s8 %v1101_v31 }
 0x19f   :  { %v137_v17 = vrot.slane %v136_v13, 2  ;;  %v473_v22 = vsel %vm471_vm12, %v469_v18, -9e+15  ;;  %v474_v24 = vsel %vm23_vm0, %v472_v20, -inf  ;;  %v371_v14 = vmul.f32 0.2, %v367_v4 }
 0x1a0   :  { %v233_v21 = vrot.slane %v232_v15, 2  ;;  %v475_v19 = vsel %vm23_vm0, %v473_v22, -inf  ;;  %vm369_vm13 = vcmp.gt.f32.partialorder %v367_v4, 0.0  ;;  %vm308_vm11 = vcmask 130112  }
 0x1a1   :  { %v138_v25 = vmax.f32 %v136_v13, %v137_v17  ;;  %v476_v27 = vmax.f32 %v474_v24, %v475_v19  ;;  %v357_v17 = vcvt.s32.f32 %v930_v9  ;;  %v373_v24 = vsel %vm369_vm13, %v367_v4, %v371_v14 }
 0x1a2   :  { %v234_v26 = vmax.f32 %v232_v15, %v233_v21 }
 0x1a3   :  { %v139_v28 = vrot.slane %v138_v25, 1  ;;  %v477_v30 = vrot.slane %v476_v27, 4  ;;  %vm376_vm15 = vcmp.gt.f32.partialorder %v357_v17, 0.0 }
 0x1a4   :  { %v235_v29 = vrot.slane %v234_v26, 1 }
 0x1a5   :  { %v140_v32 = vmax.f32 %v138_v25, %v139_v28  ;;  %v478_v34 = vmax.f32 %v476_v27, %v477_v30 }
 0x1a6   :  { %v236_v33 = vmax.f32 %v234_v26, %v235_v29 }
 0x1a7   :  { %v141_v35 = vsub.f32 %v130_v59, %v140_v32  ;;  %v142_v36 = vsub.f32 %v131_v60, %v140_v32  ;;  %v479_v39 = vrot.slane %v478_v34, 2 }
 0x1a8   :  { %v237_v37 = vsub.f32 %v226_v1, %v236_v33  ;;  %v238_v38 = vsub.f32 %v227_v2, %v236_v33  ;;  %v929_v2 = vunpack.c.2.s8 %v1101_v31 }
 0x1a9   :  { %v143_v40 = vmul.f32 1.442695, %v141_v35  ;;  %v145_v41 = vmul.f32 1.442695, %v142_v36  ;;  %v480_v44 = vmax.f32 %v478_v34, %v479_v39 }
 0x1aa   :  { %v239_v42 = vmul.f32 1.442695, %v237_v37  ;;  %v241_v43 = vmul.f32 1.442695, %v238_v38  ;;  %v356_v13 = vcvt.s32.f32 %v929_v2 }
 0x1ab   :  { %977 = vpow2.f32 %v143_v40  ;;  %v481_v45 = vrot.slane %v480_v44, 1 }
 0x1ac   :  { %979 = vpow2.f32 %v145_v41  ;;  %vm375_vm14 = vcmp.gt.f32.partialorder %v356_v13, 0.0 }
 0x1ad   :  { %981 = vpow2.f32 %v241_v43  ;;  %v482_v46 = vmax.f32 %v480_v44, %v481_v45  ;;  %v377_v27 = vsel %vm375_vm14, %v373_v24, -9e+15 }
 0x1ae   :  { %983 = vpow2.f32 %v239_v42  ;;  %v379_v33 = vsel %vm23_vm0, %v377_v27, -inf }
 0x1af   :  { %v483_v47 = vsub.f32 %v472_v20, %v482_v46  ;;  %v484_v48 = vsub.f32 %v473_v22, %v482_v46 }
 0x1b1   :  { %v978_v49 = vpop.eup %977  ;;  %v485_v53 = vmul.f32 1.442695, %v483_v47  ;;  %v487_v54 = vmul.f32 1.442695, %v484_v48 }
 0x1b2   :  { %v1119_v51 = vpop.eup %979  ;;  %v147_v52 = vsel %vm23_vm0, %v978_v49, 0.0 }
 0x1b3   :  { %v982_v55 = vpop.eup %981  ;;  %v148_v56 = vsel %vm23_vm0, %v1119_v51, 0.0  ;;  %985 = vpow2.f32 %v485_v53 }
 0x1b4   :  { %v984_v57 = vpop.eup %983  ;;  %v149_v58 = vadd.f32 %v148_v56, %v147_v52  ;;  %v244_v59 = vsel %vm23_vm0, %v982_v55, 0.0  ;;  %987 = vpow2.f32 %v487_v54 }
 0x1b5   :  { %v243_v60 = vsel %vm23_vm0, %v984_v57, 0.0 }
 0x1b6   :  { %v150_v62 = vrot.slane %v149_v58, 4  ;;  %v245_v63 = vadd.f32 %v244_v59, %v243_v60 }
 0x1b8   :  { %v151_v0 = vadd.f32 %v150_v62, %v149_v58  ;;  %v246_v1 = vrot.slane %v245_v63, 4 }
 0x1b9   :  { %v1128_v3 = vpop.eup %985 }
 0x1ba   :  { %v152_v5 = vrot.slane %v151_v0, 2  ;;  %v247_v6 = vadd.f32 %v246_v1, %v245_v63  ;;  %v1131_v7 = vpop.eup %987  ;;  %v489_v8 = vsel %vm23_vm0, %v1128_v3, 0.0 }
 0x1bb   :  { %v490_v50 = vsel %vm23_vm0, %v1131_v7, 0.0 }
 0x1bc   :  { %v153_v10 = vadd.f32 %v152_v5, %v151_v0  ;;  %v248_v11 = vrot.slane %v247_v6, 2  ;;  %v491_v12 = vadd.f32 %v490_v50, %v489_v8 }
 0x1be   :  { %v154_v15 = vrot.slane %v153_v10, 1  ;;  %v249_v16 = vadd.f32 %v248_v11, %v247_v6  ;;  %v492_v23 = vrot.slane %v491_v12, 4 }
 0x1c0   :  { %v155_v18 = vadd.f32 %v154_v15, %v153_v10  ;;  %v250_v20 = vrot.slane %v249_v16, 1  ;;  %v493_v21 = vadd.f32 %v492_v23, %v491_v12 }
 0x1c1   :  { %v364_v22 = vpop.permute.xlu2 %363 }
 0x1c2   :  { %v368_v25 = vadd.f32 %v366_v61, %v364_v22  ;;  %989 = vrcp.f32 %v155_v18  ;;  %v251_v19 = vadd.f32 %v250_v20, %v249_v16  ;;  %v494_v31 = vrot.slane %v493_v21, 2 }
 0x1c4   :  { %vm370_vm1 = vcmp.gt.f32.partialorder %v368_v25, 0.0  ;;  %v372_v26 = vmul.f32 0.2, %v368_v25  ;;  %991 = vrcp.f32 %v251_v19  ;;  %v495_v28 = vadd.f32 %v494_v31, %v493_v21 }
 0x1c6   :  { %v374_v29 = vsel %vm370_vm1, %v368_v25, %v372_v26  ;;  %v496_v35 = vrot.slane %v495_v28, 1 }
 0x1c7   :  { %v378_v30 = vsel %vm376_vm15, %v374_v29, -9e+15 }
 0x1c8   :  { %v990_v32 = vpop.eup %989  ;;  %v380_v34 = vsel %vm23_vm0, %v378_v30, -inf  ;;  %v497_v42 = vadd.f32 %v496_v35, %v495_v28 }
 0x1c9   :  { %v381_v36 = vmax.f32 %v379_v33, %v380_v34  ;;  %v157_v37 = vmul.f32 %v990_v32, %v978_v49  ;;  %v158_v46 = vmul.f32 %v990_v32, %v1119_v51 }
 0x1ca   :  { %v992_v38 = vpop.eup %991  ;;  %993 = vrcp.f32 %v497_v42 }
 0x1cb   :  { %v382_v39 = vrot.slane %v381_v36, 4  ;;  %883 = vmatmul.msk.f32.vlgmr.msrb.gmra.mxu1 %vm23_vm0, %v157_v37  ;;  %v253_v40 = vmul.f32 %v992_v38, %v984_v57  ;;  %v254_v41 = vmul.f32 %v992_v38, %v982_v55 }
 0x1cd   :  { %v383_v43 = vmax.f32 %v381_v36, %v382_v39  ;;  %887 = vmatmul.msk.f32.vlgmr.msra.gmra.mxu2 %vm23_vm0, %v253_v40  ;;  %888 = vmatmul.msk.f32.vlgmr.msra.gmra.mxu3 %vm23_vm0, %v254_v41 }
 0x1cf   :  { %v384_v44 = vrot.slane %v383_v43, 2 }
 0x1d0   :  { %v994_v49 = vpop.eup %993 }
 0x1d1   :  { %v385_v45 = vmax.f32 %v383_v43, %v384_v44  ;;  %v499_v56 = vmul.f32 %v994_v49, %v1128_v3  ;;  %v500_v58 = vmul.f32 %v994_v49, %v1131_v7 }
 0x1d3   :  { %v386_v47 = vrot.slane %v385_v45, 1  ;;  %884 = vmatmul.msk.f32.gmra.mxu1 %vm23_vm0, %v158_v46  ;;  %v561_v46 = vld [vmem:[%s1201_s3 + $0x8] sm:$0xff] }
 0x1d4   :  { %588 = vmatpush.msrb.mxu2 %v561_v46 }
 0x1d5   :  { %v387_v48 = vmax.f32 %v385_v45, %v386_v47  ;;  %v560_v47 = vld [vmem:[%s1201_s3] sm:$0xff]  ;;  %s1043_s3 = smov 123  }
 0x1d6   :  { %589 = vmatpush.msrb.mxu2 %v560_v47 }
 0x1d7   :  { %v388_v52 = vsub.f32 %v377_v27, %v387_v48  ;;  %v389_v53 = vsub.f32 %v378_v30, %v387_v48 }
 0x1d9   :  { %v390_v54 = vmul.f32 1.442695, %v388_v52  ;;  %v392_v55 = vmul.f32 1.442695, %v389_v53 }
 0x1db   :  { %995 = vpow2.f32 %v390_v54  ;;  %899 = vmatmul.msk.f32.vlgmr.msra.gmra.mxu1 %vm23_vm0, %v499_v56 }
 0x1dc   :  { %997 = vpow2.f32 %v392_v55 }
 0x1e1   :  { %v996_v57 = vpop.eup %995 }
 0x1e2   :  { %v998_v59 = vpop.eup %997  ;;  %v394_v51 = vsel %vm23_vm0, %v996_v57, 0.0 }
 0x1e3   :  { %v395_v60 = vsel %vm23_vm0, %v998_v59, 0.0  ;;  %900 = vmatmul.msk.f32.gmra.mxu1 %vm23_vm0, %v500_v58  ;;  %v1042_v58 = vmov 4  }
 0x1e4   :  { %v396_v61 = vadd.f32 %v395_v60, %v394_v51  ;;  %975 = vset.pattern.permute.xlu0 %v1042_v58  ;;  %976 = vset.pattern.permute.xlu2 %v1042_v58 }
 0x1e6   :  { %v397_v62 = vrot.slane %v396_v61, 4 }
 0x1e8   :  { %v398_v63 = vadd.f32 %v397_v62, %v396_v61 }
 0x1ea   :  { %v399_v0 = vrot.slane %v398_v63, 2 }
 0x1ec   :  { %v400_v1 = vadd.f32 %v399_v0, %v398_v63 }
 0x1ee   :  { %v401_v2 = vrot.slane %v400_v1, 1 }
 0x1f0   :  { %v402_v3 = vadd.f32 %v401_v2, %v400_v1 }
 0x1f2   :  { %999 = vrcp.f32 %v402_v3 }
 0x1f8   :  { %v1000_v4 = vpop.eup %999 }
 0x1f9   :  { %v404_v5 = vmul.f32 %v1000_v4, %v996_v57  ;;  %v405_v6 = vmul.f32 %v1000_v4, %v998_v59 }
 0x1fb   :  { %893 = vmatmul.msk.f32.vlgmr.msrb.gmra.mxu3 %vm23_vm0, %v404_v5  ;;  %v936_v5 = vld [vmem:[%s1200_s1] sm:$0xff]  }
 0x203   :  { %894 = vmatmul.msk.f32.gmra.mxu3 %vm23_vm0, %v405_v6  ;;  %v937_v6 = vunpack.c.0.s8 %v936_v5 }
 0x248   :  { %v182_v7 = vpop.f32.mrf.mxu1 }
 0x249   :  { %v190_v8 = vmul.f32 1.442695, %v182_v7  ;;  %vm188_vm3 = vcmp.gt.f32.partialorder %v182_v7, 0.0 }
 0x24b   :  { %1001 = vpow2.f32 %v190_v8  ;;  %v647_v8 = vcvt.s32.f32 %v937_v6 }
 0x24d   :  { %vm666_vm12 = vcmp.gt.f32.partialorder %v647_v8, 0.0 }
 0x250   :  { %v284_v50 = vpop.f32.mrf.mxu2  ;;  %v287_v9 = vpop.f32.mrf.mxu3 }
 0x251   :  { %v1002_v10 = vpop.eup %1001  ;;  %v292_v11 = vmul.f32 1.442695, %v284_v50  ;;  %v185_v12 = vpop.f32.mrf.mxu1  ;;  %v294_v15 = vmul.f32 1.442695, %v287_v9  ;;  %vm290_vm4 = vcmp.gt.f32.partialorder %v284_v50, 0.0  ;;  %vm291_vm6 = vcmp.gt.f32.partialorder %v287_v9, 0.0 }
 0x252   :  { %v885_v13 = vadd.f32 -1.0, %v1002_v10  ;;  %v192_v14 = vmul.f32 1.442695, %v185_v12  ;;  %vm189_vm5 = vcmp.gt.f32.partialorder %v185_v12, 0.0 }
 0x253   :  { %1003 = vpow2.f32 %v292_v11 }
 0x254   :  { %v196_v16 = vsel %vm188_vm3, %v182_v7, %v885_v13  ;;  %1005 = vpow2.f32 %v192_v14  ;;  %v938_v7 = vunpack.c.1.s8 %v936_v5 }
 0x255   :  { %199 = vst.msk [vmem:[#allocation2] sm:$0xff] %vm198_vm2, %v196_v16  ;;  %1007 = vpow2.f32 %v294_v15 }
 0x259   :  { %v1004_v23 = vpop.eup %1003  ;;  %v530_v17 = vpop.f32.mrf.mxu1 }
 0x25a   :  { %v889_v18 = vadd.f32 -1.0, %v1004_v23  ;;  %v538_v20 = vmul.f32 1.442695, %v530_v17  ;;  %v1006_v21 = vpop.eup %1005  ;;  %vm536_vm7 = vcmp.gt.f32.partialorder %v530_v17, 0.0 }
 0x25b   :  { %v886_v22 = vadd.f32 -1.0, %v1006_v21  ;;  %v1008_v25 = vpop.eup %1007 }
 0x25c   :  { %1009 = vpow2.f32 %v538_v20  ;;  %v298_v24 = vsel %vm290_vm4, %v284_v50, %v889_v18  ;;  %v890_v31 = vadd.f32 -1.0, %v1008_v25  ;;  %v648_v50 = vcvt.s32.f32 %v938_v7 }
 0x25d   :  { %302 = vrot.lane.b32.xlu0 %v298_v24, %s1041_s5  ;;  %v197_v19 = vsel %vm189_vm5, %v185_v12, %v886_v22  ;;  %vm736_vm5 = vcmask 31744  }
 0x25e   :  { %200 = vst.msk [vmem:[#allocation2 + $0x8] sm:$0xff] %vm198_vm2, %v197_v19  ;;  %v299_v30 = vsel %vm291_vm6, %v287_v9, %v890_v31  ;;  %vm667_vm13 = vcmp.gt.f32.partialorder %v648_v50, 0.0 }
 0x261   :  { %v533_v26 = vpop.f32.mrf.mxu1 }
 0x262   :  { %v1010_v27 = vpop.eup %1009  ;;  %v540_v28 = vmul.f32 1.442695, %v533_v26  ;;  %vm537_vm8 = vcmp.gt.f32.partialorder %v533_v26, 0.0 }
 0x263   :  { %v901_v29 = vadd.f32 -1.0, %v1010_v27  ;;  %v942_v27 = vunpack.c.3.s8 %v936_v5 }
 0x264   :  { %1011 = vpow2.f32 %v540_v28 }
 0x265   :  { %304 = vrot.lane.b32.xlu0 %v299_v30, %s1041_s5  ;;  %v544_v32 = vsel %vm536_vm7, %v530_v17, %v901_v29 }
 0x266   :  { %548 = vrot.lane.b32.xlu1 %v544_v32, %s1041_s5 }
 0x26a   :  { %v1012_v33 = vpop.eup %1011 }
 0x26b   :  { %v902_v34 = vadd.f32 -1.0, %v1012_v33 }
 0x26d   :  { %v545_v35 = vsel %vm537_vm8, %v533_v26, %v902_v34  ;;  %v941_v26 = vunpack.c.2.s8 %v936_v5  ;;  %v784_v34 = vcvt.s32.f32 %v942_v27 }
 0x26e   :  { %550 = vrot.lane.b32.xlu0 %v545_v35, %s1041_s5 }
 0x26f   :  { %v783_v33 = vcvt.s32.f32 %v941_v26  ;;  %vm803_vm4 = vcmp.gt.f32.partialorder %v784_v34, 0.0 }
 0x271   :  { %vm802_vm3 = vcmp.gt.f32.partialorder %v783_v33, 0.0 }
 0x27e   :  { %v429_v36 = vpop.f32.mrf.mxu3 }
 0x27f   :  { %v437_v37 = vmul.f32 1.442695, %v429_v36  ;;  %vm435_vm9 = vcmp.gt.f32.partialorder %v429_v36, 0.0 }
 0x281   :  { %1013 = vpow2.f32 %v437_v37 }
 0x286   :  { %v432_v38 = vpop.f32.mrf.mxu3 }
 0x287   :  { %v1014_v39 = vpop.eup %1013  ;;  %v439_v40 = vmul.f32 1.442695, %v432_v38  ;;  %vm436_vm10 = vcmp.gt.f32.partialorder %v432_v38, 0.0 }
 0x288   :  { %v895_v41 = vadd.f32 -1.0, %v1014_v39 }
 0x289   :  { %1015 = vpow2.f32 %v439_v40 }
 0x28a   :  { %v443_v42 = vsel %vm435_vm9, %v429_v36, %v895_v41 }
 0x28b   :  { %445 = vst.msk [vmem:[#allocation2 + $0x10] sm:$0xff] %vm198_vm2, %v443_v42 }
 0x28f   :  { %v1016_v43 = vpop.eup %1015 }
 0x290   :  { %v896_v44 = vadd.f32 -1.0, %v1016_v43 }
 0x292   :  { %v444_v45 = vsel %vm436_vm10, %v432_v38, %v896_v44 }
 0x293   :  { %446 = vst.msk [vmem:[#allocation2 + $0x18] sm:$0xff] %vm198_vm2, %v444_v45 }
 0x2cf   :  { %v303_v48 = vpop.permute.xlu0 %302 }
 0x2d0   :  { %309 = vst.msk [vmem:[#allocation2] sm:$0xff] %vm308_vm11, %v303_v48 }
 0x2d7   :  { %v305_v49 = vpop.permute.xlu0 %304  ;;  %v556_v52 = vld [vmem:[#allocation2] sm:$0xff] }
 0x2d8   :  { %310 = vst.msk [vmem:[#allocation2 + $0x8] sm:$0xff] %vm308_vm11, %v305_v49  ;;  %903 = vmatmul.msk.f32.vlgmr.msrb.gmra.mxu2 %vm23_vm0, %v556_v52  ;;  %v549_v53 = vpop.permute.xlu1 %548 }
 0x2d9   :  { %554 = vst.msk [vmem:[#allocation2 + $0x10] sm:$0xff] %vm308_vm11, %v549_v53 }
 0x2df   :  { %v557_v54 = vld [vmem:[#allocation2 + $0x8] sm:$0xff] }
 0x2e0   :  { %904 = vmatmul.msk.f32.gmra.mxu2 %vm23_vm0, %v557_v54  ;;  %v551_v55 = vpop.permute.xlu0 %550  ;;  %v558_v56 = vld [vmem:[#allocation2 + $0x10] sm:$0xff] }
 0x2e1   :  { %555 = vst.msk [vmem:[#allocation2 + $0x18] sm:$0xff] %vm308_vm11, %v551_v55 }
 0x2e8   :  { %905 = vmatmul.msk.f32.gmra.mxu2 %vm23_vm0, %v558_v56  ;;  %v559_v57 = vld [vmem:[#allocation2 + $0x18] sm:$0xff] }
 0x2f0   :  { %906 = vmatmul.msk.f32.gmra.mxu2 %vm23_vm0, %v559_v57 }
 0x35b   :  { %v591_v59 = vpop.f32.mrf.mxu2 }
 0x35c   :  { %605 = vrot.lane.b32.xlu0 %v591_v59, %s1043_s3 }
 0x363   :  { %v594_v51 = vpop.f32.mrf.mxu2 }
 0x364   :  { %650 = vperm.xlu0 %975, %v591_v59   ;;  %717 = vmatpush.msra.mxu3 %v594_v51 }
 0x366   :  { %718 = vmatpush.msra.mxu3 %v591_v59 }
 0x36b   :  { %v597_v60 = vpop.f32.mrf.mxu2 }
 0x36c   :  { %607 = vrot.lane.b32.xlu0 %v594_v51, %s1043_s3 }
 0x373   :  { %v600_v61 = vpop.f32.mrf.mxu2 }
 0x374   :  { %654 = vperm.xlu0 %975, %v594_v51   ;;  %790 = vperm.xlu2 %976, %v600_v61  }
 0x375   :  { %853 = vmatpush.msrb.mxu0 %v600_v61 }
 0x377   :  { %854 = vmatpush.msrb.mxu0 %v597_v60 }
 0x37c   :  { %741 = vrot.lane.b32.xlu0 %v597_v60, %s1043_s3 }
 0x384   :  { %786 = vperm.xlu0 %975, %v597_v60  }
 0x38c   :  { %743 = vrot.lane.b32.xlu0 %v600_v61, %s1043_s3 }
 0x3ce   :  { %v606_v62 = vpop.permute.xlu0 %605  ;;  %v791_v24 = vpop.permute.xlu2 %790 }
 0x3cf   :  { %611 = vxpose.xlu0.b32.start [1/2] (short) (narrow) %v606_v62, 8 }
 0x3d6   :  { %v651_v63 = vpop.permute.xlu0 %650 }
 0x3de   :  { %v608_v0 = vpop.permute.xlu0 %607 }
 0x3df   :  { %612 = vxpose.xlu0.b32.end [2/2] (short) (narrow) %v608_v0, 8 }
 0x3e6   :  { %v655_v1 = vpop.permute.xlu0 %654 }
 0x3ee   :  { %v742_v2 = vpop.permute.xlu0 %741 }
 0x3ef   :  { %747 = vxpose.xlu2.b32.start [1/2] (short) (narrow) %v742_v2, 8 }
 0x3f6   :  { %v787_v3 = vpop.permute.xlu0 %786 }
 0x3fe   :  { %v744_v4 = vpop.permute.xlu0 %743 }
 0x3ff   :  { %748 = vxpose.xlu2.b32.end [2/2] (short) (narrow) %v744_v4, 8 }
 0x47b   :  { %v627_v9 = vpop.trf.xlu0 }
 0x47c   :  { %v657_v10 = vperm.slane %v627_v9, 0 }
 0x47e   :  { %v658_v11 = vadd.f32 %v657_v10, %v651_v63  ;;  %v659_v12 = vadd.f32 %v657_v10, %v655_v1 }
 0x480   :  { %vm660_vm14 = vcmp.gt.f32.partialorder %v658_v11, 0.0  ;;  %vm661_vm15 = vcmp.gt.f32.partialorder %v659_v12, 0.0  ;;  %v662_v13 = vmul.f32 0.2, %v658_v11  ;;  %v663_v14 = vmul.f32 0.2, %v659_v12 }
 0x482   :  { %v664_v15 = vsel %vm660_vm14, %v658_v11, %v662_v13  ;;  %v665_v16 = vsel %vm661_vm15, %v659_v12, %v663_v14 }
 0x483   :  { %v668_v23 = vsel %vm666_vm12, %v664_v15, -9e+15  ;;  %v669_v17 = vsel %vm667_vm13, %v665_v16, -9e+15 }
 0x484   :  { %v670_v18 = vsel %vm23_vm0, %v668_v23, -inf  ;;  %v671_v20 = vsel %vm23_vm0, %v669_v17, -inf }
 0x485   :  { %v672_v21 = vmax.f32 %v670_v18, %v671_v20 }
 0x487   :  { %v673_v22 = vrot.slane %v672_v21, 4 }
 0x489   :  { %v674_v25 = vmax.f32 %v672_v21, %v673_v22 }
 0x48b   :  { %v675_v19 = vrot.slane %v674_v25, 2 }
 0x48d   :  { %v676_v31 = vmax.f32 %v674_v25, %v675_v19 }
 0x48f   :  { %v677_v28 = vrot.slane %v676_v31, 1 }
 0x490   :  { %v763_v29 = vpop.trf.xlu2 }
 0x491   :  { %v678_v30 = vmax.f32 %v676_v31, %v677_v28  ;;  %v793_v32 = vperm.slane %v763_v29, 0 }
 0x493   :  { %v679_v35 = vsub.f32 %v668_v23, %v678_v30  ;;  %v680_v36 = vsub.f32 %v669_v17, %v678_v30  ;;  %v794_v37 = vadd.f32 %v793_v32, %v787_v3  ;;  %v795_v38 = vadd.f32 %v793_v32, %v791_v24 }
 0x495   :  { %v681_v39 = vmul.f32 1.442695, %v679_v35  ;;  %v683_v40 = vmul.f32 1.442695, %v680_v36  ;;  %vm796_vm1 = vcmp.gt.f32.partialorder %v794_v37, 0.0  ;;  %vm797_vm2 = vcmp.gt.f32.partialorder %v795_v38, 0.0 }
 0x496   :  { %v798_v41 = vmul.f32 0.2, %v794_v37  ;;  %v799_v42 = vmul.f32 0.2, %v795_v38 }
 0x497   :  { %1017 = vpow2.f32 %v681_v39 }
 0x498   :  { %1019 = vpow2.f32 %v683_v40  ;;  %v800_v43 = vsel %vm796_vm1, %v794_v37, %v798_v41  ;;  %v801_v44 = vsel %vm797_vm2, %v795_v38, %v799_v42 }
 0x499   :  { %v804_v45 = vsel %vm802_vm3, %v800_v43, -9e+15  ;;  %v805_v46 = vsel %vm803_vm4, %v801_v44, -9e+15 }
 0x49a   :  { %v806_v47 = vsel %vm23_vm0, %v804_v45, -inf  ;;  %v807_v48 = vsel %vm23_vm0, %v805_v46, -inf }
 0x49b   :  { %v808_v49 = vmax.f32 %v806_v47, %v807_v48 }
 0x49d   :  { %v1018_v52 = vpop.eup %1017  ;;  %v809_v53 = vrot.slane %v808_v49, 4 }
 0x49e   :  { %v1020_v54 = vpop.eup %1019  ;;  %v685_v55 = vsel %vm23_vm0, %v1018_v52, 0.0 }
 0x49f   :  { %v686_v56 = vsel %vm23_vm0, %v1020_v54, 0.0  ;;  %v810_v57 = vmax.f32 %v808_v49, %v809_v53 }
 0x4a0   :  { %v687_v58 = vadd.f32 %v686_v56, %v685_v55 }
 0x4a1   :  { %v811_v59 = vrot.slane %v810_v57, 2 }
 0x4a2   :  { %v688_v51 = vrot.slane %v687_v58, 4 }
 0x4a3   :  { %v812_v60 = vmax.f32 %v810_v57, %v811_v59 }
 0x4a4   :  { %v689_v61 = vadd.f32 %v688_v51, %v687_v58 }
 0x4a5   :  { %v813_v62 = vrot.slane %v812_v60, 1 }
 0x4a6   :  { %v690_v63 = vrot.slane %v689_v61, 2 }
 0x4a7   :  { %v814_v0 = vmax.f32 %v812_v60, %v813_v62 }
 0x4a8   :  { %v691_v1 = vadd.f32 %v690_v63, %v689_v61 }
 0x4a9   :  { %v815_v2 = vsub.f32 %v804_v45, %v814_v0  ;;  %v816_v3 = vsub.f32 %v805_v46, %v814_v0 }
 0x4aa   :  { %v692_v4 = vrot.slane %v691_v1, 1 }
 0x4ab   :  { %v817_v5 = vmul.f32 1.442695, %v815_v2  ;;  %v819_v6 = vmul.f32 1.442695, %v816_v3 }
 0x4ac   :  { %v693_v7 = vadd.f32 %v692_v4, %v691_v1 }
 0x4ad   :  { %1021 = vpow2.f32 %v817_v5 }
 0x4ae   :  { %1023 = vpow2.f32 %v819_v6 }
 0x4af   :  { %1025 = vrcp.f32 %v693_v7 }
 0x4b3   :  { %v1022_v8 = vpop.eup %1021 }
 0x4b4   :  { %v1024_v50 = vpop.eup %1023  ;;  %v821_v9 = vsel %vm23_vm0, %v1022_v8, 0.0 }
 0x4b5   :  { %v1026_v10 = vpop.eup %1025  ;;  %v822_v11 = vsel %vm23_vm0, %v1024_v50, 0.0 }
 0x4b6   :  { %v823_v12 = vadd.f32 %v822_v11, %v821_v9  ;;  %v695_v13 = vmul.f32 %v1026_v10, %v1018_v52  ;;  %v696_v23 = vmul.f32 %v1026_v10, %v1020_v54 }
 0x4b8   :  { %v824_v14 = vrot.slane %v823_v12, 4  ;;  %907 = vmatmul.msk.f32.vlgmr.msra.gmra.mxu3 %vm23_vm0, %v695_v13 }
 0x4ba   :  { %v825_v15 = vadd.f32 %v824_v14, %v823_v12 }
 0x4bc   :  { %v826_v16 = vrot.slane %v825_v15, 2 }
 0x4be   :  { %v827_v17 = vadd.f32 %v826_v16, %v825_v15 }
 0x4c0   :  { %908 = vmatmul.msk.f32.gmra.mxu3 %vm23_vm0, %v696_v23  ;;  %v828_v18 = vrot.slane %v827_v17, 1 }
 0x4c2   :  { %v829_v20 = vadd.f32 %v828_v18, %v827_v17 }
 0x4c4   :  { %1027 = vrcp.f32 %v829_v20 }
 0x4ca   :  { %v1028_v21 = vpop.eup %1027 }
 0x4cb   :  { %v831_v22 = vmul.f32 %v1028_v21, %v1022_v8  ;;  %v832_v24 = vmul.f32 %v1028_v21, %v1024_v50 }
 0x4cd   :  { %913 = vmatmul.msk.f32.vlgmr.msrb.gmra.mxu0 %vm23_vm0, %v831_v22 }
 0x4d5   :  { %914 = vmatmul.msk.f32.gmra.mxu0 %vm23_vm0, %v832_v24 }
 0x53b   :  { %v720_v25 = vpop.f32.mrf.mxu3 }
 0x53c   :  { %v728_v19 = vmul.f32 1.442695, %v720_v25  ;;  %vm726_vm6 = vcmp.gt.f32.partialorder %v720_v25, 0.0 }
 0x53e   :  { %1029 = vpow2.f32 %v728_v19 }
 0x543   :  { %v723_v31 = vpop.f32.mrf.mxu3 }
 0x544   :  { %v1030_v26 = vpop.eup %1029  ;;  %v730_v27 = vmul.f32 1.442695, %v723_v31  ;;  %vm727_vm0 = vcmp.gt.f32.partialorder %v723_v31, 0.0 }
 0x545   :  { %v909_v28 = vadd.f32 -1.0, %v1030_v26 }
 0x546   :  { %1031 = vpow2.f32 %v730_v27 }
 0x547   :  { %v734_v29 = vsel %vm726_vm6, %v720_v25, %v909_v28 }
 0x548   :  { %737 = vst.msk [vmem:[%s1202_s4] sm:$0xff] %vm736_vm5, %v734_v29 }
 0x54a   :  { %v856_v30 = vpop.f32.mrf.mxu0 }
 0x54b   :  { %v864_v32 = vmul.f32 1.442695, %v856_v30  ;;  %vm862_vm7 = vcmp.gt.f32.partialorder %v856_v30, 0.0 }
 0x54c   :  { %v1032_v33 = vpop.eup %1031 }
 0x54d   :  { %v910_v34 = vadd.f32 -1.0, %v1032_v33  ;;  %1033 = vpow2.f32 %v864_v32 }
 0x54f   :  { %v735_v35 = vsel %vm727_vm0, %v723_v31, %v910_v34 }
 0x550   :  { %738 = vst.msk [vmem:[%s1202_s4 + $0x8] sm:$0xff] %vm736_vm5, %v735_v35 }
 0x552   :  { %v859_v36 = vpop.f32.mrf.mxu0 }
 0x553   :  { %v1034_v37 = vpop.eup %1033  ;;  %v866_v38 = vmul.f32 1.442695, %v859_v36  ;;  %vm863_vm8 = vcmp.gt.f32.partialorder %v859_v36, 0.0 }
 0x554   :  { %v915_v39 = vadd.f32 -1.0, %v1034_v37 }
 0x555   :  { %1035 = vpow2.f32 %v866_v38 }
 0x556   :  { %v870_v40 = vsel %vm862_vm7, %v856_v30, %v915_v39 }
 0x557   :  { %917 = vst.msk [vmem:[%s1202_s4 + $0x10] sm:$0xff] %vm736_vm5, %v870_v40 }
 0x55b   :  { %v1036_v41 = vpop.eup %1035 }
 0x55c   :  { %v916_v42 = vadd.f32 -1.0, %v1036_v41 }
 0x55e   :  { %v871_v43 = vsel %vm863_vm8, %v859_v36, %v916_v42 }
 0x55f   :  { %918 = vst.msk [vmem:[%s1202_s4 + $0x18] sm:$0xff] %vm736_vm5, %v871_v43 }

</bundles_post_ra>
